<compile_context>
chip_gen: v5e
topology: v5e:2x2
jax: 0.10.0
libtpu: 0.0.40
codegen_flags: <defaults>
</compile_context>

<pallas_src>
import functools

import jax
import jax.numpy as jnp
from jax.experimental import pallas as pl
from jax.experimental.pallas import tpu as pltpu


def _clamp_kernel(x_ref, o_ref, *, min_val, max_val):
    x = x_ref[...]
    # Mirror torch semantics exactly: clamp(min=...) then clamp(max=...).
    # NOTE: for integer dtypes a fractional bound is truncated by the cast;
    # harmless for the module's default 0 / 1 bounds.
    x = jnp.maximum(x, jnp.asarray(min_val, dtype=x.dtype))
    x = jnp.minimum(x, jnp.asarray(max_val, dtype=x.dtype))
    o_ref[...] = x


def _jnp_clamp(x, min_val, max_val):
    """Reference / fallback path (matches torch double-clamp ordering)."""
    x = jnp.maximum(x, jnp.asarray(min_val, dtype=x.dtype))
    return jnp.minimum(x, jnp.asarray(max_val, dtype=x.dtype))


def _tpu_defaults():
    """(target_block_bytes, vmem_limit_bytes) keyed on TPU generation."""
    kind = ""
    try:
        kind = jax.devices()[0].device_kind.lower()
    except Exception:  # pragma: no cover - defensive; defaults are safe.
        pass
    if "v7" in kind:
        # Faster HBM -> bigger blocks.  4 buffers x 8 MiB = 32 MiB < 48 MiB
        # limit < 64 MiB physical VMEM.
        return 8 * 1024 * 1024, 48 * 1024 * 1024
    # v5e / v6e / unknown: 4 MiB blocks, 4 x 4 MiB = 16 MiB < 32 MiB limit.
    return 4 * 1024 * 1024, 32 * 1024 * 1024


def _choose_tile_rows(rows, bytes_per_row, sublane, target_block_bytes, want_multi):
    """Pick sublane-aligned block rows near the byte target.

    If `want_multi`, also try to give the grid >= 2 (ideally an even number
    of) blocks so both v7x TensorCores stream.
    """
    if rows <= sublane:
        return rows

    target_rows = max(sublane, (target_block_bytes // bytes_per_row) // sublane * sublane)
    if not want_multi and rows <= target_rows:
        return rows  # single block, small slab

    upper = min(target_rows, rows)
    if want_multi:
        # Cap so there are at least 2 blocks.
        half = -(-rows // 2)                       # ceil(rows / 2)
        half = -(-half // sublane) * sublane       # round up to sublane
        upper = min(upper, max(sublane, half))
        if upper >= rows:
            upper = max(sublane, rows - sublane)
    upper = max(sublane, (upper // sublane) * sublane)

    # Prefer an exact divisor of `rows` (full, unmasked blocks); among those
    # prefer one giving an even block count (megacore balance).
    best_divisor = None
    r = upper
    while r >= sublane:
        if rows % r == 0:
            n = rows // r
            if (not want_multi) or (n % 2 == 0):
                return r
            if best_divisor is None:
                best_divisor = r
        r -= sublane
    if best_divisor is not None:
        return best_divisor
    # No aligned divisor: keep the capped tile; Pallas masks the partial
    # trailing block (safe for elementwise).
    return upper


def clamp_pallas(
    x,
    min_val=0.0,
    max_val=1.0,
    *,
    target_block_bytes=None,
    vmem_limit_bytes=None,
    small_fallback_bytes=512 * 1024,
    donate_input=False,
):
    """Elementwise double-clamp, matching torch.clamp(torch.clamp(x, min), max)."""
    orig_shape = x.shape
    dtype = x.dtype
    total = int(x.size)
    itemsize = jnp.dtype(dtype).itemsize
    total_bytes = total * itemsize

    if target_block_bytes is None or vmem_limit_bytes is None:
        tb, vl = _tpu_defaults()
        target_block_bytes = tb if target_block_bytes is None else target_block_bytes
        vmem_limit_bytes = vl if vmem_limit_bytes is None else vmem_limit_bytes

    lane = 128
    sublane = max(8, 32 // itemsize)  # 8 for f32, 16 for bf16, 32 for int8

    # Tiny inputs: pallas_call launch overhead dwarfs the work; XLA's fused
    # clamp is already at roofline.  Pure latency win.
    if total == 0 or total_bytes < small_fallback_bytes:
        return _jnp_clamp(x, min_val, max_val)

    # Pick a wide, lane-dense last dim that evenly divides the element count.
    W = None
    for cand in (8192, 4096, 2048, 1024, 512, 256, 128):
        if total % cand == 0:
            W = cand
            break
    if W is None:
        # Element count not a multiple of 128 (rare).  A padded kernel path
        # would cost an extra full HBM copy (pad + slice), so just let XLA's
        # fused elementwise clamp handle it - same one-read/one-write traffic.
        return _jnp_clamp(x, min_val, max_val)

    rows = total // W
    x2d = jnp.reshape(x, (rows, W))  # contiguous reshape -> no HBM traffic

    want_multi = total_bytes >= 2 * 1024 * 1024  # worth splitting across 2 TCs
    tile_rows = _choose_tile_rows(rows, W * itemsize, sublane, target_block_bytes, want_multi)
    grid = (pl.cdiv(rows, tile_rows),)

    kernel = functools.partial(_clamp_kernel, min_val=min_val, max_val=max_val)

    out2d = pl.pallas_call(
        kernel,
        out_shape=jax.ShapeDtypeStruct((rows, W), dtype),
        grid=grid,
        in_specs=[pl.BlockSpec((tile_rows, W), lambda i: (i, 0))],
        out_specs=pl.BlockSpec((tile_rows, W), lambda i: (i, 0)),
        input_output_aliases=({0: 0} if donate_input else {}),
        compiler_params=pltpu.CompilerParams(
            dimension_semantics=("parallel",),
            vmem_limit_bytes=vmem_limit_bytes,
        ),
    )(x2d)

    return jnp.reshape(out2d, orig_shape)


if __name__ == "__main__":
    key = jax.random.PRNGKey(0)

    # Primary test: NCHW input like the PyTorch module, values outside [0, 1].
    # small_fallback_bytes=0 forces the Pallas path even at this small size.
    x = jax.random.normal(key, (2, 4, 16, 16), dtype=jnp.float32) * 2.0
    out = jax.block_until_ready(
        clamp_pallas(x, min_val=0.0, max_val=1.0, small_fallback_bytes=0)
    )
    ref = jnp.minimum(jnp.maximum(x, 0.0), 1.0)
    assert out.shape == x.shape and out.dtype == x.dtype
    assert jnp.allclose(out, ref), "mismatch vs reference (primary)"

    # Secondary test: multi-block tiled path (>= 2 MiB -> >= 2 grid steps).
    k2 = jax.random.PRNGKey(1)
    x_big = jax.random.normal(k2, (16, 16, 64, 64), dtype=jnp.float32) * 3.0
    out_big = jax.block_until_ready(clamp_pallas(x_big, 0.0, 1.0))
    ref_big = jnp.minimum(jnp.maximum(x_big, 0.0), 1.0)
    assert jnp.allclose(out_big, ref_big), "mismatch vs reference (tiled)"

    # Tertiary test: odd element count / tiny input -> jnp fallback path.
    k3 = jax.random.PRNGKey(2)
    x_odd = jax.random.normal(k3, (3, 5, 7, 11), dtype=jnp.float32) * 2.0
    out_odd = jax.block_until_ready(clamp_pallas(x_odd, 0.0, 1.0))
    ref_odd = jnp.minimum(jnp.maximum(x_odd, 0.0), 1.0)
    assert out_odd.shape == x_odd.shape
    assert jnp.allclose(out_odd, ref_odd), "mismatch vs reference (odd size)"

    print("KERNEL_OK")
</pallas_src>

<mosaic_0001>
module attributes {stable_mosaic.version = 11 : i64} {
  func.func @_clamp_kernel(%arg0: i32, %arg1: memref<1x2048xf32, #tpu.memory_space<vmem>>, %arg2: memref<1x2048xf32, #tpu.memory_space<vmem>>) attributes {dimension_semantics = [#tpu.dimension_semantics<parallel>], iteration_bounds = array<i64: 1>, scalar_prefetch = 0 : i64, scratch_operands = 0 : i64, tpu.core_type = #tpu.core_type<tc>, window_params = [{transform_indices = @transform_0, window_bounds = array<i64: 1, 2048>}, {transform_indices = @transform_1, window_bounds = array<i64: 1, 2048>}]} {
    %c0 = arith.constant 0 : index
    %c0_0 = arith.constant 0 : index
    %0 = vector.load %arg1[%c0, %c0_0] : memref<1x2048xf32, #tpu.memory_space<vmem>>, vector<1x2048xf32>
    %cst = arith.constant 0.000000e+00 : f32
    %1 = vector.broadcast %cst : f32 to vector<1x2048xf32>
    %2 = arith.maximumf %0, %1 : vector<1x2048xf32>
    %cst_1 = arith.constant 1.000000e+00 : f32
    %3 = vector.broadcast %cst_1 : f32 to vector<1x2048xf32>
    %4 = arith.minimumf %2, %3 : vector<1x2048xf32>
    %c0_2 = arith.constant 0 : index
    %c0_3 = arith.constant 0 : index
    %5 = vector.load %arg2[%c0_2, %c0_3] : memref<1x2048xf32, #tpu.memory_space<vmem>>, vector<1x2048xf32>
    tpu.vector_store %arg2[%c0_2, %c0_3], %4 {strides = array<i32>} : memref<1x2048xf32, #tpu.memory_space<vmem>>, vector<1x2048xf32>,
    return
  }
  func.func @transform_0(%arg0: i32) -> (i32, i32) {
    %c0_i32 = arith.constant 0 : i32
    %c0_i32_0 = arith.constant 0 : i32
    return %arg0, %c0_i32 : i32, i32
  }
  func.func @transform_1(%arg0: i32) -> (i32, i32) {
    %c0_i32 = arith.constant 0 : i32
    %c0_i32_0 = arith.constant 0 : i32
    return %arg0, %c0_i32 : i32, i32
  }
}

</mosaic_0001>

<bundles_post_ra>
// kernel: tpu_custom_call.1
= control target key start
LH: loop header
LB: loop body
LE: loop exit
PB: predicated region body
PF: predicated region fallthrough
CT: control target
= control target key end

     0   :  { %6 = vsyncpa [#allocation3], 0  ;;  %s120_s0 = inlined_call_operand.hbm [shape: f32[1,2048], index: 0, kind: input, shape index: {}]   ;;  %s121_s1 = inlined_call_operand.hbm [shape: f32[1,2048], index: 1, kind: output, shape index: {}]  }
   0x1   :  { %7 = vsyncpa [#allocation4], 0  ;;  %s13_s8 = sshll.u32 %s120_s0, 4  ;;  %s102_s9 = smov [#allocation2]   ;;  %s14_s8 = int_to_ptr.hbm [resolvable:$true] %s13_s8 }
   0x2   :  { %s15_s10 = sshll.u32 %s102_s9, 4  ;;  %s16_s10 = int_to_ptr.vmem [resolvable:$true] %s15_s10 }
   0x3   :  { %18 = dma.hbm_to_vmem [thread:$0]  %s14_s8, 256, %s16_s10, [#allocation3]  }
   0x4   :  { %98 = dma.done.wait [#allocation3], 256  }
   0x5   :  { %99 = vsyncadd [#allocation3], 4294967040  ;;  %v23_v0 = vld [vmem:[#allocation2] sm:$0xff]  ;;  %v24_v1 = vld [vmem:[#allocation2 + $0x8] sm:$0xff]  ;;  %s103_s11 = smov [#allocation5]   ;;  %s38_s15 = sshll.u32 %s121_s1, 4  ;;  %s39_s15 = int_to_ptr.hbm [resolvable:$true] %s38_s15 }
   0x6   :  { %v25_v2 = vmax.f32 %v23_v0, 0.0  ;;  %v26_v3 = vmax.f32 %v24_v1, 0.0  ;;  %s36_s12 = sshll.u32 %s103_s11, 4  ;;  %s37_s12 = int_to_ptr.vmem [resolvable:$true] %s36_s12 }
   0x8   :  { %v27_v4 = vmin.f32 %v25_v2, 1.0  ;;  %v28_v5 = vmin.f32 %v26_v3, 1.0 }
   0xa   :  { %29 = vst [vmem:[#allocation5] sm:$0xff] %v27_v4 }
   0xb   :  { %30 = vst [vmem:[#allocation5 + $0x8] sm:$0xff] %v28_v5 }
   0xc   :  { %41 = dma.vmem_to_hbm [thread:$0]  %s37_s12, 256, %s39_s15, [#allocation4]  }
   0xd   :  { %100 = dma.done.wait [#allocation4], 256  }
   0xe   :  { %101 = vsyncadd [#allocation4], 4294967040 }
   0xf   :  { %46 = vsyncpa [#allocation3], 1 }
  0x10   :  { %47 = vsyncpa [#allocation4], 1 }

</bundles_post_ra>
